<compile_context>
chip_gen: v6e
topology: v6e:2x2x1
jax: 0.10.0
libtpu: 0.0.40
codegen_flags: <defaults>
</compile_context>

<pallas_src>
import math

import numpy as np

import jax
import jax.numpy as jnp
from jax import lax
from jax.experimental import pallas as pl
from jax.experimental.pallas import tpu as pltpu


def _sphere_packed_kernel(x_ref, seg_ref, segt_ref, o_ref):
    """Tile (tm, k*n): k logical rows of length n packed per physical row.

    seg_ref:  (k*n, k) bf16 0/1 segment matrix   (lane c -> group c // n)
    segt_ref: (k, k*n) bf16 transposed segment matrix
    """
    x = x_ref[...]                                  # (tm, width), input dtype
    xf = x.astype(jnp.float32)
    x2 = xf * xf                                    # f32 squares

    # hi/lo split: each dot is a native single-pass bf16 MXU matmul with an
    # exact 0/1 RHS and f32 accumulation; the pair recovers ~f32 accuracy.
    x2_hi = x2.astype(jnp.bfloat16)
    x2_lo = (x2 - x2_hi.astype(jnp.float32)).astype(jnp.bfloat16)
    seg = seg_ref[...]
    sq = (jnp.dot(x2_hi, seg, preferred_element_type=jnp.float32)
          + jnp.dot(x2_lo, seg, preferred_element_type=jnp.float32))   # (tm, k)

    inv = lax.rsqrt(sq)                                                # (tm, k) f32

    # Broadcast each group's inverse norm across its n lanes, again via a
    # 2-pass hi/lo bf16 matmul against the 0/1 transposed segment matrix
    # (exactly one nonzero per output lane -> no accumulation error).
    inv_hi = inv.astype(jnp.bfloat16)
    inv_lo = (inv - inv_hi.astype(jnp.float32)).astype(jnp.bfloat16)
    segt = segt_ref[...]
    inv_full = (jnp.dot(inv_hi, segt, preferred_element_type=jnp.float32)
                + jnp.dot(inv_lo, segt, preferred_element_type=jnp.float32))

    o_ref[...] = (xf * inv_full).astype(o_ref.dtype)


def _sphere_plain_kernel(x_ref, o_ref):
    """Tile (tm, N): one logical row per physical row, lane reduction."""
    x = x_ref[...]
    xf = x.astype(jnp.float32)
    sq = jnp.sum(xf * xf, axis=-1, keepdims=True)   # (tm, 1) f32
    inv = lax.rsqrt(sq)
    o_ref[...] = (xf * inv).astype(o_ref.dtype)


def _vmem_capacity_bytes():
    try:
        info = pltpu.get_tpu_info()
        cap = getattr(info, "vmem_capacity_bytes", None)
        if cap:
            return int(cap)
    except Exception:
        pass
    return 64 << 20  # conservative default (v7x per-TensorCore VMEM)


def sphere_normalize(x, dim=-1, target_tile_bytes=None):
    """x / x.norm(dim=dim, keepdim=True)  (matches torch Sphere.forward)."""
    ndim = x.ndim
    dim = dim % ndim
    if dim != ndim - 1:
        x = jnp.moveaxis(x, dim, -1)
    orig_shape = x.shape
    N = int(orig_shape[-1])
    M = int(np.prod(orig_shape[:-1])) if ndim > 1 else 1

    itemsize = jnp.dtype(x.dtype).itemsize
    sub = {4: 8, 2: 16, 1: 32}.get(itemsize, 8)      # sublane minimum per dtype

    vmem_cap = _vmem_capacity_bytes()
    vmem_budget = (vmem_cap * 3) // 4                # ~25% headroom
    if target_tile_bytes is None:
        # Bigger tiles on 128 MiB VMEM chips (v5e/v6e), moderate on v7x (64 MiB).
        target_tile_bytes = (8 << 20) if vmem_cap >= (96 << 20) else (5 << 20)

    # Lane packing: fold p = 128 // gcd(N, 128) consecutive logical rows into
    # one physical row so the row width is a multiple of 128 lanes
    # (lane-dense, unmasked loads/stores).  Pure row-major reshape, no copy.
    p = 128 // math.gcd(N, 128)
    if (p > 1 and M % p == 0
            and p * N * itemsize <= max(target_tile_bytes // 2, 1 << 20)):
        k = p
    else:
        # TODO(synk): rows that cannot pack evenly stay lane-masked (correct,
        # just not lane-dense).
        k = 1
    R = M // k
    width = k * N
    row_bytes = width * itemsize

    def needed_vmem(tm_):
        io = 4 * tm_ * row_bytes                     # double-buffered in + out
        tmp = 3 * tm_ * width * 4                    # f32 body temporaries
        segb = (2 * width * k * 2) if k > 1 else 0   # resident bf16 seg matrices
        return io + tmp + segb + (2 << 20)           # slack

    # Row tile: ~target_tile_bytes per block, multiple of the sublane minimum.
    tm = max(sub, (target_tile_bytes // max(row_bytes, 1)) // sub * sub)
    if R * row_bytes >= (4 << 20):
        # Keep at least 2 grid steps so both v7x TensorCores get work.
        half = -(-R // 2)
        half = -(-half // sub) * sub
        tm = min(tm, half)
    if tm >= R:
        tm = R                                       # full first dim -> legal block

    # Shrink until the footprint fits the per-core VMEM budget.
    while tm > sub and needed_vmem(tm) > vmem_budget:
        tm = max(sub, ((tm // 2) // sub) * sub)

    if needed_vmem(tm) > vmem_budget:
        # TODO(synk): add a width-tiled two-phase kernel (accumulate sq, then
        # rescale) for normalized axes too wide for a single VMEM block; fall
        # back to XLA for those pathological shapes.
        xf = x.astype(jnp.float32)
        out = (xf * lax.rsqrt(jnp.sum(xf * xf, axis=-1, keepdims=True))).astype(x.dtype)
        if dim != ndim - 1:
            out = jnp.moveaxis(out, -1, dim)
        return out

    grid_m = pl.cdiv(R, tm)                          # partial last block masked on write
    vmem_limit = int(min(max(needed_vmem(tm), 32 << 20), vmem_budget))

    x2d = x.reshape(R, width)

    cost = pl.CostEstimate(
        flops=8 * M * N,
        transcendentals=M,
        bytes_accessed=2 * M * N * itemsize,
    )
    compiler_params = pltpu.CompilerParams(
        dimension_semantics=("parallel",),
        vmem_limit_bytes=vmem_limit,
    )

    if k > 1:
        # 0/1 segment matrices (exact in bf16), built once on the host and
        # passed as constant operands (constant index_map -> fetched once).
        col = np.arange(width) // N
        seg_np = (col[:, None] == np.arange(k)[None, :]).astype(np.float32)
        seg = jnp.asarray(seg_np, dtype=jnp.bfloat16)
        seg_t = jnp.asarray(seg_np.T, dtype=jnp.bfloat16)

        out2d = pl.pallas_call(
            _sphere_packed_kernel,
            out_shape=jax.ShapeDtypeStruct((R, width), x.dtype),
            grid_spec=pltpu.PrefetchScalarGridSpec(
                num_scalar_prefetch=0,
                grid=(grid_m,),
                in_specs=[
                    pl.BlockSpec((tm, width), lambda i: (i, 0)),
                    pl.BlockSpec((width, k), lambda i: (0, 0)),
                    pl.BlockSpec((k, width), lambda i: (0, 0)),
                ],
                out_specs=pl.BlockSpec((tm, width), lambda i: (i, 0)),
            ),
            compiler_params=compiler_params,
            cost_estimate=cost,
        )(x2d, seg, seg_t)
    else:
        out2d = pl.pallas_call(
            _sphere_plain_kernel,
            out_shape=jax.ShapeDtypeStruct((R, width), x.dtype),
            grid_spec=pltpu.PrefetchScalarGridSpec(
                num_scalar_prefetch=0,
                grid=(grid_m,),
                in_specs=[pl.BlockSpec((tm, width), lambda i: (i, 0))],
                out_specs=pl.BlockSpec((tm, width), lambda i: (i, 0)),
            ),
            compiler_params=compiler_params,
            cost_estimate=cost,
        )(x2d)

    out = out2d.reshape(orig_shape)
    if dim != ndim - 1:
        out = jnp.moveaxis(out, -1, dim)
    return out


class Sphere:
    """Functional mirror of the PyTorch Sphere module."""

    def __init__(self, dim=-1):
        self.dim = dim

    def __call__(self, x):
        return sphere_normalize(x, dim=self.dim)

    def right_inverse(self, x):
        return sphere_normalize(x, dim=self.dim)


if __name__ == "__main__":
    key = jax.random.PRNGKey(0)

    # Small NCHW-like input: [B=2, C=4, H=16, W=16]; normalize over W (dim=-1).
    x = jax.random.normal(key, (2, 4, 16, 16), dtype=jnp.float32)
    out = Sphere(dim=-1)(x)
    out = jax.block_until_ready(out)
    ref = x / jnp.linalg.norm(x, axis=-1, keepdims=True)
    assert out.shape == x.shape
    assert out.dtype == x.dtype
    assert jnp.allclose(out, ref, atol=2e-5, rtol=2e-5)

    # Sanity-check the un-packed (k == 1) path with a lane-dense width.
    x2 = jax.random.normal(jax.random.PRNGKey(1), (4, 256), dtype=jnp.float32)
    out2 = jax.block_until_ready(Sphere(dim=-1)(x2))
    ref2 = x2 / jnp.linalg.norm(x2, axis=-1, keepdims=True)
    assert jnp.allclose(out2, ref2, atol=2e-5, rtol=2e-5)

    print("KERNEL_OK")
</pallas_src>

<mosaic_0001>
module attributes {stable_mosaic.version = 11 : i64} {
  func.func @_sphere_packed_kernel(%arg0: i32, %arg1: memref<16x128xf32, #tpu.memory_space<vmem>>, %arg2: memref<128x8xbf16, #tpu.memory_space<vmem>>, %arg3: memref<8x128xbf16, #tpu.memory_space<vmem>>, %arg4: memref<16x128xf32, #tpu.memory_space<vmem>>) attributes {dimension_semantics = [#tpu.dimension_semantics<parallel>], iteration_bounds = array<i64: 1>, scalar_prefetch = 0 : i64, scratch_operands = 0 : i64, tpu.core_type = #tpu.core_type<tc>, window_params = [{transform_indices = @transform_0, window_bounds = array<i64: 16, 128>}, {pipeline_mode = #tpu.pipeline_mode<synchronous>, transform_indices = @transform_1, window_bounds = array<i64: 128, 8>}, {pipeline_mode = #tpu.pipeline_mode<synchronous>, transform_indices = @transform_2, window_bounds = array<i64: 8, 128>}, {transform_indices = @transform_3, window_bounds = array<i64: 16, 128>}]} {
    %c0 = arith.constant 0 : index
    %c0_0 = arith.constant 0 : index
    %0 = vector.load %arg1[%c0, %c0_0] : memref<16x128xf32, #tpu.memory_space<vmem>>, vector<16x128xf32>
    %1 = arith.mulf %0, %0 : vector<16x128xf32>
    %2 = arith.truncf %1 : vector<16x128xf32> to vector<16x128xbf16>
    %3 = arith.extf %2 : vector<16x128xbf16> to vector<16x128xf32>
    %4 = arith.subf %1, %3 : vector<16x128xf32>
    %5 = arith.truncf %4 : vector<16x128xf32> to vector<16x128xbf16>
    %c0_1 = arith.constant 0 : index
    %c0_2 = arith.constant 0 : index
    %6 = vector.load %arg2[%c0_1, %c0_2] : memref<128x8xbf16, #tpu.memory_space<vmem>>, vector<128x8xbf16>
    %cst = arith.constant dense<0.000000e+00> : vector<16x8xf32>
    %7 = tpu.matmul %2, %6, %cst {dimension_numbers = #tpu.dot_dimension_numbers<[1], [0], [0], [1], [0, 0, 1, 1], [], []>} : vector<16x128xbf16>, vector<128x8xbf16>, vector<16x8xf32> -> vector<16x8xf32>
    %cst_3 = arith.constant dense<0.000000e+00> : vector<16x8xf32>
    %8 = tpu.matmul %5, %6, %cst_3 {dimension_numbers = #tpu.dot_dimension_numbers<[1], [0], [0], [1], [0, 0, 1, 1], [], []>} : vector<16x128xbf16>, vector<128x8xbf16>, vector<16x8xf32> -> vector<16x8xf32>
    %9 = arith.addf %7, %8 : vector<16x8xf32>
    %10 = math.rsqrt %9 : vector<16x8xf32>
    %11 = arith.truncf %10 : vector<16x8xf32> to vector<16x8xbf16>
    %12 = arith.extf %11 : vector<16x8xbf16> to vector<16x8xf32>
    %13 = arith.subf %10, %12 : vector<16x8xf32>
    %14 = arith.truncf %13 : vector<16x8xf32> to vector<16x8xbf16>
    %c0_4 = arith.constant 0 : index
    %c0_5 = arith.constant 0 : index
    %15 = vector.load %arg3[%c0_4, %c0_5] : memref<8x128xbf16, #tpu.memory_space<vmem>>, vector<8x128xbf16>
    %cst_6 = arith.constant dense<0.000000e+00> : vector<16x128xf32>
    %16 = tpu.matmul %11, %15, %cst_6 {dimension_numbers = #tpu.dot_dimension_numbers<[1], [0], [0], [1], [0, 0, 1, 1], [], []>} : vector<16x8xbf16>, vector<8x128xbf16>, vector<16x128xf32> -> vector<16x128xf32>
    %cst_7 = arith.constant dense<0.000000e+00> : vector<16x128xf32>
    %17 = tpu.matmul %14, %15, %cst_7 {dimension_numbers = #tpu.dot_dimension_numbers<[1], [0], [0], [1], [0, 0, 1, 1], [], []>} : vector<16x8xbf16>, vector<8x128xbf16>, vector<16x128xf32> -> vector<16x128xf32>
    %18 = arith.addf %16, %17 : vector<16x128xf32>
    %19 = arith.mulf %0, %18 : vector<16x128xf32>
    %c0_8 = arith.constant 0 : index
    %c0_9 = arith.constant 0 : index
    %20 = vector.load %arg4[%c0_8, %c0_9] : memref<16x128xf32, #tpu.memory_space<vmem>>, vector<16x128xf32>
    tpu.vector_store %arg4[%c0_8, %c0_9], %19 {strides = array<i32>} : memref<16x128xf32, #tpu.memory_space<vmem>>, vector<16x128xf32>,
    return
  }
  func.func @transform_0(%arg0: i32) -> (i32, i32) {
    %c0_i32 = arith.constant 0 : i32
    %c0_i32_0 = arith.constant 0 : i32
    return %arg0, %c0_i32 : i32, i32
  }
  func.func @transform_1(%arg0: i32) -> (i32, i32) {
    %c0_i32 = arith.constant 0 : i32
    %c0_i32_0 = arith.constant 0 : i32
    %c0_i32_1 = arith.constant 0 : i32
    return %c0_i32, %c0_i32_0 : i32, i32
  }
  func.func @transform_2(%arg0: i32) -> (i32, i32) {
    %c0_i32 = arith.constant 0 : i32
    %c0_i32_0 = arith.constant 0 : i32
    %c0_i32_1 = arith.constant 0 : i32
    return %c0_i32, %c0_i32_0 : i32, i32
  }
  func.func @transform_3(%arg0: i32) -> (i32, i32) {
    %c0_i32 = arith.constant 0 : i32
    %c0_i32_0 = arith.constant 0 : i32
    return %arg0, %c0_i32 : i32, i32
  }
}

</mosaic_0001>

<bundles_post_ra>
// kernel: tpu_custom_call.1
= control target key start
LH: loop header
LB: loop body
LE: loop exit
PB: predicated region body
PF: predicated region fallthrough
CT: control target
= control target key end

     0   :  { %v417_v1 = vmov 0.0   ;;  %vm418_vm0 = vmmov 0   ;;  %s492_s0 = inlined_call_operand.vmem [shape: f32[16,128], index: 0, kind: input, shape index: {}]   ;;  %s493_s1 = inlined_call_operand.vmem [shape: bf16[128,8], index: 1, kind: input, shape index: {}]   ;;  %s494_s2 = inlined_call_operand.vmem [shape: bf16[8,128], index: 2, kind: input, shape index: {}]   ;;  %s495_s3 = inlined_call_operand.hbm [shape: f32[16,128], index: 3, kind: output, shape index: {}]  }
   0x1   :  { %v383_v0 = vld [vmem:[%s493_s1 + $0x38] sm:$0xff]   ;;  %326 = vmatprep.subr.bf16.mxu0 %v417_v1  ;;  %346 = vmatprep.subr.bf16.mxu1 %v417_v1  ;;  %v384_v2 = vld [vmem:[%s493_s1 + $0x30] sm:$0xff]   ;;  %v385_v3 = vld [vmem:[%s493_s1 + $0x28] sm:$0xff]  }
   0x2   :  { %327 = vmatpush3.bf16.msra.mxu0 %v383_v0  ;;  %347 = vmatpush3.bf16.msra.mxu1 %v383_v0 }
   0x3   :  { %328 = vmatprep.subr.bf16.mxu0 %v417_v1  ;;  %348 = vmatprep.subr.bf16.mxu1 %v417_v1 }
   0x4   :  { %342 = vmatprep.mubr.msk.bf16.mxu0 %vm418_vm0, %v417_v1  ;;  %362 = vmatprep.mubr.msk.bf16.mxu1 %vm418_vm0, %v417_v1 }
   0x6   :  { %329 = vmatpush3.bf16.msra.mxu0 %v384_v2  ;;  %349 = vmatpush3.bf16.msra.mxu1 %v384_v2 }
   0x7   :  { %330 = vmatprep.subr.bf16.mxu0 %v417_v1  ;;  %350 = vmatprep.subr.bf16.mxu1 %v417_v1 }
   0x8   :  { %8 = vsyncpa [#allocation3], 0  ;;  %v386_v4 = vld [vmem:[%s493_s1 + $0x20] sm:$0xff]   ;;  %v464_v6 = vld [vmem:[%s492_s0 + $0x8] sm:$0xff]  ;;  %vm185_vm1 = vcmask 1043456   ;;  %vm181_vm2 = vcmask 64512  }
   0x9   :  { %v459_v5 = vld [vmem:[%s492_s0] sm:$0xff]  ;;  %v19_v8 = vmul.f32 %v464_v6, %v464_v6  ;;  %v387_v9 = vld [vmem:[%s493_s1 + $0x18] sm:$0xff]   ;;  %v388_v11 = vld [vmem:[%s493_s1 + $0x10] sm:$0xff]  }
   0xa   :  { %331 = vmatpush3.bf16.msra.mxu0 %v385_v3  ;;  %351 = vmatpush3.bf16.msra.mxu1 %v385_v3  ;;  %v18_v7 = vmul.f32 %v459_v5, %v459_v5  ;;  %v389_v14 = vld [vmem:[%s493_s1 + $0x8] sm:$0xff]   ;;  %v390_v17 = vld [vmem:[%s493_s1] sm:$0xff]   ;;  %s419_s1 = smov [#allocation2]  }
   0xb   :  { %332 = vmatprep.subr.bf16.mxu0 %v417_v1  ;;  %352 = vmatprep.subr.bf16.mxu1 %v417_v1  ;;  %v180_v19 = vld [vmem:[%s494_s2] sm:$0xf]  ;;  %s283_s2 = sshll.u32 %s419_s1, 4  ;;  %s284_s2 = int_to_ptr.vmem [resolvable:$true] %s283_s2 }
   0xc   :  { %v20_v10 = vpack.c.bf16 %v19_v8, %v18_v7  ;;  %v187_v20 = vsel %vm185_vm1, %v180_v19, 0  ;;  %s395_s6 = scalar_lea.vmem %s284_s2, 256  ;;  %p400_p1 = scmp.lt.s32.totalorder %s284_s2, %s284_s2 }
   0xd   :  { %p396_p0 = scmp.ne.s32.totalorder %s284_s2, %s395_s6  ;;  %p401_p2 = scmp.lt.s32.totalorder %s395_s6, %s395_s6 }
   0xe   :  { %333 = vmatpush3.bf16.msra.mxu0 %v386_v4  ;;  %353 = vmatpush3.bf16.msra.mxu1 %v386_v4  ;;  %v21_v12 = vunpack.c.l.bf16 %v20_v10  ;;  %v22_v13 = vunpack.c.h.bf16 %v20_v10 }
   0xf   :  { %334 = vmatprep.subr.bf16.mxu0 %v417_v1  ;;  %354 = vmatprep.subr.bf16.mxu1 %v417_v1  ;;  %p402_p3 = por %p401_p2, %p400_p1 }
  0x10   :  { %v23_v15 = vsub.f32 %v18_v7, %v21_v12  ;;  %v24_v16 = vsub.f32 %v19_v8, %v22_v13 }
  0x11   :  { %p403_p4 = pnand %p402_p3, %p396_p0 }
  0x12   :  { %335 = vmatpush3.bf16.msra.mxu0 %v387_v9  ;;  %355 = vmatpush3.bf16.msra.mxu1 %v387_v9  ;;  %v25_v18 = vpack.c.bf16 %v24_v16, %v23_v15 }
  0x13   :  { %336 = vmatprep.subr.bf16.mxu0 %v417_v1  ;;  %356 = vmatprep.subr.bf16.mxu1 %v417_v1 }
  0x16   :  { %337 = vmatpush3.bf16.msra.mxu0 %v388_v11  ;;  %357 = vmatpush3.bf16.msra.mxu1 %v388_v11 }
  0x17   :  { %338 = vmatprep.subr.bf16.mxu0 %v417_v1  ;;  %358 = vmatprep.subr.bf16.mxu1 %v417_v1 }
  0x1a   :  { %339 = vmatpush3.bf16.msra.mxu0 %v389_v14  ;;  %359 = vmatpush3.bf16.msra.mxu1 %v389_v14 }
  0x1b   :  { %340 = vmatprep.subr.bf16.mxu0 %v417_v1  ;;  %360 = vmatprep.subr.bf16.mxu1 %v417_v1 }
  0x1e   :  { %341 = vmatpush3.bf16.msra.mxu0 %v390_v17  ;;  %361 = vmatpush3.bf16.msra.mxu1 %v390_v17 }
  0x1f   :  { %372 = vmatprep.subr.bf16.mxu1 %v417_v1  ;;  %366 = vmatprep.subr.bf16.mxu0 %v417_v1 }
  0x21   :  { %343 = vmatmul.mubr.bf16.vlgmr.msra.gmra.mxu0 %v25_v18  ;;  %363 = vmatmul.mubr.bf16.vlgmr.msra.gmra.mxu1 %v20_v10 }
  0x22   :  { %374 = vmatprep.mubr.msk.bf16.mxu1 %vm418_vm0, %v417_v1  ;;  %368 = vmatprep.mubr.msk.bf16.mxu0 %vm418_vm0, %v417_v1 }
  0x23   :  { %373 = vmatpush3.bf16.msra.mxu1 %v187_v20  ;;  %367 = vmatpush3.bf16.msra.mxu0 %v187_v20 }
  0xe1   :  { %v124_v21 = vpop.f32.mrf.mxu0  ;;  %v165_v22 = vpop.f32.mrf.mxu1 }
  0xe2   :  { %v166_v23 = vadd.f32 %v165_v22, %v124_v21 }
  0xe3   :  { %v344_v24 = vpop.f32.mrf.mxu0  ;;  %v364_v25 = vpop.f32.mrf.mxu1 }
  0xe4   :  { %391 = vrsqrt.f32 %v166_v23 }
  0xe5   :  { %v127_v26 = vpop.f32.mrf.mxu0  ;;  %v168_v27 = vpop.f32.mrf.mxu1 }
  0xe6   :  { %v169_v28 = vadd.f32 %v168_v27, %v127_v26 }
  0xe7   :  { %v345_v29 = vpop.f32.mrf.mxu0  ;;  %v365_v30 = vpop.f32.mrf.mxu1 }
  0xe8   :  { %393 = vrsqrt.f32 %v169_v28 }
  0xf1   :  { %v392_v31 = vpop.eup %391 }
  0xf5   :  { %v394_v32 = vpop.eup %393 }
  0xf6   :  { %v174_v33 = vpack.c.bf16 %v394_v32, %v392_v31 }
  0xf8   :  { %375 = vmatmul.mubr.msk.bf16.vlgmr.msra.gmra.mxu1 %vm181_vm2, %v174_v33  ;;  %v175_v34 = vunpack.c.l.bf16 %v174_v33  ;;  %v176_v35 = vunpack.c.h.bf16 %v174_v33 }
  0xfa   :  { %v177_v36 = vsub.f32 %v392_v31, %v175_v34  ;;  %v178_v37 = vsub.f32 %v394_v32, %v176_v35 }
  0xfc   :  { %v179_v38 = vpack.c.bf16 %v178_v37, %v177_v36 }
  0xfe   :  { %369 = vmatmul.mubr.msk.bf16.vlgmr.msra.gmra.mxu0 %vm181_vm2, %v179_v38 }
 0x1b8   :  { %v267_v39 = vpop.f32.mrf.mxu1 }
 0x1ba   :  { %v376_v40 = vpop.f32.mrf.mxu1 }
 0x1bc   :  { %v270_v41 = vpop.f32.mrf.mxu1 }
 0x1be   :  { %v223_v42 = vpop.f32.mrf.mxu0  ;;  %v377_v43 = vpop.f32.mrf.mxu1 }
 0x1bf   :  { %v268_v44 = vadd.f32 %v267_v39, %v223_v42 }
 0x1c0   :  { %v370_v45 = vpop.f32.mrf.mxu0 }
 0x1c1   :  { %v274_v46 = vmul.f32 %v268_v44, %v459_v5 }
 0x1c2   :  { %v226_v47 = vpop.f32.mrf.mxu0 }
 0x1c3   :  { %276 = vst [vmem:[#allocation2] sm:$0xff] %v274_v46  ;;  %v271_v48 = vadd.f32 %v270_v41, %v226_v47 }
 0x1c4   :  { %v371_v49 = vpop.f32.mrf.mxu0 }
 0x1c5   :  { %v275_v50 = vmul.f32 %v271_v48, %v464_v6 }
 0x1c7   :  { %277 = vst [vmem:[#allocation2 + $0x8] sm:$0xff] %v275_v50 }
 0x1c8   :  { %406 = shalt.err (!%p403_p4)
}
 0x1c9   :  { %s420_s7 = smov 128   ;;  %s421_s8 = smov 8  }
 0x1ca   :  { %289 = dma.vmem_to_hbm [thread:$0]  %s284_s2, 256, %s495_s3, [#allocation3], %s420_s7, %s420_s7, %s421_s8  }
 0x1cb   :  { %415 = dma.done.wait [#allocation3], 256  }
 0x1cc   :  { %416 = vsyncadd [#allocation3], 4294967040 }
 0x1cd   :  { %293 = vsyncpa [#allocation3], 1 }

</bundles_post_ra>
